<compile_context>
chip_gen: v6e
topology: v6e:2x2x1
jax: 0.10.0
libtpu: 0.0.40
codegen_flags: <defaults>
</compile_context>

<pallas_src>
import jax
import jax.numpy as jnp
from jax import lax
from jax.experimental import pallas as pl
from jax.experimental.pallas import tpu as pltpu

_INNER_SUB = 64  # sub-tiles per in-kernel accumulation chunk (64*8*128*4B = 256 KiB f32)


def _make_mse_partial_kernel(inner_sub, n_inner, sub_rows):
    def kernel(pred_ref, gt_ref, out_ref):
        # pred_ref / gt_ref: (tile_sub, sub_rows, 128) lane-dense VMEM tiles.
        def body(j, acc):
            start = pl.multiple_of(j * inner_sub, inner_sub)
            p = pred_ref[pl.ds(start, inner_sub), :, :].astype(jnp.float32)
            g = gt_ref[pl.ds(start, inner_sub), :, :].astype(jnp.float32)
            d = p - g
            # Reduce only over the leading sub-tile axis: pure VPU adds that hide under the
            # DMA-bound tile loads; the tiny cross-lane reduction happens once outside.
            return acc + jnp.sum(d * d, axis=0)

        acc0 = jnp.zeros((sub_rows, 128), jnp.float32)
        out_ref[0] = lax.fori_loop(0, n_inner, body, acc0, unroll=True)

    return kernel


def _sq_err_sum_f32(a, b):
    d = a.astype(jnp.float32) - b.astype(jnp.float32)
    return jnp.sum(d * d)


def mse_loss(h_pred, h_gt, *, min_pallas_elems=1 << 20, tile_subblocks=512):
    """Mean squared error over [B, 3, 3] tensors (== torch.nn.functional.mse_loss)."""
    if h_pred.ndim != 3 or h_pred.shape[1:] != (3, 3):
        raise ValueError('H_pred must have shape [batch_size, 3, 3].')
    if h_gt.ndim != 3 or h_gt.shape[1:] != (3, 3):
        raise ValueError('H_gt must have shape [batch_size, 3, 3].')
    if h_pred.shape[0] != h_gt.shape[0]:
        raise ValueError('H_pred and H_gt must have the same batch size.')

    b = h_pred.shape[0]
    n_elems = b * 9

    # Common compute dtype / packing geometry.
    out_dtype = jnp.result_type(h_pred.dtype, h_gt.dtype)
    cdt = out_dtype
    itemsize = jnp.dtype(cdt).itemsize
    if itemsize == 2:
        sub_rows = 16          # bf16/f16 native sublane packing: (16, 128) per vreg-tile
    elif itemsize == 4:
        sub_rows = 8
    else:
        cdt = jnp.float32      # uncommon dtypes: compute in f32
        itemsize = 4
        sub_rows = 8
    sub_elems = sub_rows * 128

    p = h_pred.astype(cdt)
    g = h_gt.astype(cdt)

    n_sub_full = n_elems // sub_elems

    if n_elems < min_pallas_elems or n_sub_full == 0:
        # Small inputs: XLA's fused reduction reads each input exactly once with no staging
        # copy and no launch overhead — it wins below a few MiB.
        total = _sq_err_sum_f32(p, g)
        return (total / jnp.float32(n_elems)).astype(out_dtype)

    # ---- tile sizing (static Python ints) ----
    tile_sub = max(1, min(int(tile_subblocks), n_sub_full))
    if n_sub_full >= 4 * _INNER_SUB:
        # Keep >= 4 grid steps so v7x's two TensorCores both stream HBM (neutral on v5e/v6e).
        tile_sub = max(1, min(tile_sub, n_sub_full // 4))
    inner_sub = min(_INNER_SUB, tile_sub)
    tile_sub = (tile_sub // inner_sub) * inner_sub          # tile_sub % inner_sub == 0
    n_inner = tile_sub // inner_sub
    num_tiles = n_sub_full // tile_sub                       # Pallas handles FULL tiles only
    pallas_sub = num_tiles * tile_sub
    pallas_elems = pallas_sub * sub_elems
    tail_elems = n_elems - pallas_elems

    # ---- lane-dense main part: bitcast reshape (no pad copy of the full array) ----
    flat_p = p.reshape(-1)
    flat_g = g.reshape(-1)
    main_p = flat_p[:pallas_elems].reshape(pallas_sub, sub_rows, 128)
    main_g = flat_g[:pallas_elems].reshape(pallas_sub, sub_rows, 128)

    kernel = _make_mse_partial_kernel(inner_sub, n_inner, sub_rows)

    partials = pl.pallas_call(
        kernel,
        out_shape=jax.ShapeDtypeStruct((num_tiles, sub_rows, 128), jnp.float32),
        grid=(num_tiles,),
        in_specs=[
            pl.BlockSpec((tile_sub, sub_rows, 128), lambda i: (i, 0, 0)),
            pl.BlockSpec((tile_sub, sub_rows, 128), lambda i: (i, 0, 0)),
        ],
        out_specs=pl.BlockSpec((1, sub_rows, 128), lambda i: (i, 0, 0)),
        compiler_params=pltpu.CompilerParams(
            dimension_semantics=("parallel",),
            vmem_limit_bytes=32 * 1024 * 1024,
        ),
        cost_estimate=pl.CostEstimate(
            flops=3 * pallas_elems,
            transcendentals=0,
            bytes_accessed=2 * pallas_elems * itemsize + num_tiles * sub_rows * 128 * 4,
        ),
    )(main_p, main_g)

    # Small un-aligned tail (< one tile) handled by a tiny fused XLA reduce.
    if tail_elems > 0:
        tail_sum = _sq_err_sum_f32(flat_p[pallas_elems:], flat_g[pallas_elems:])
    else:
        tail_sum = jnp.float32(0.0)

    total = jnp.sum(partials) + tail_sum
    return (total / jnp.float32(n_elems)).astype(out_dtype)


if __name__ == "__main__":
    key = jax.random.PRNGKey(0)
    k1, k2, k3, k4, k5, k6 = jax.random.split(key, 6)

    # 1) Tiny batch matching the module spec: default threshold -> fused XLA fallback.
    B = 2
    hp = jax.random.normal(k1, (B, 3, 3), dtype=jnp.float32)
    hg = jax.random.normal(k2, (B, 3, 3), dtype=jnp.float32)
    ref = jnp.mean((hp - hg) ** 2)
    out = mse_loss(hp, hg)
    jax.block_until_ready(out)
    assert jnp.allclose(out, ref, rtol=1e-6, atol=1e-6), (out, ref)

    # 2) Force the Pallas path: 2 full (8,128) sub-tiles through a 2-step pipelined grid
    #    plus a 652-element XLA tail (no padding anywhere).
    B2 = 300
    hp2 = jax.random.normal(k3, (B2, 3, 3), dtype=jnp.float32)
    hg2 = jax.random.normal(k4, (B2, 3, 3), dtype=jnp.float32)
    ref2 = jnp.mean((hp2 - hg2) ** 2)
    out2 = mse_loss(hp2, hg2, min_pallas_elems=0, tile_subblocks=1)
    jax.block_until_ready(out2)
    assert jnp.allclose(out2, ref2, rtol=1e-5, atol=1e-6), (out2, ref2)

    # 3) Moderate batch that exercises the in-kernel chunked fori_loop (2 inner chunks of
    #    64 sub-tiles) with a 4-element XLA tail, using the default (large-tile) settings.
    B3 = 14564  # 131076 elems -> 128 full sub-tiles, tile_sub=128, inner=64
    hp3 = jax.random.normal(k5, (B3, 3, 3), dtype=jnp.float32)
    hg3 = jax.random.normal(k6, (B3, 3, 3), dtype=jnp.float32)
    ref3 = jnp.mean((hp3 - hg3) ** 2)
    out3 = mse_loss(hp3, hg3, min_pallas_elems=0)
    jax.block_until_ready(out3)
    assert jnp.allclose(out3, ref3, rtol=1e-5, atol=1e-6), (out3, ref3)

    print("KERNEL_OK")
</pallas_src>

<mosaic_0001>
module attributes {stable_mosaic.version = 11 : i64} {
  func.func @kernel(%arg0: i32, %arg1: memref<1x8x128xf32, #tpu.memory_space<vmem>>, %arg2: memref<1x8x128xf32, #tpu.memory_space<vmem>>, %arg3: memref<1x8x128xf32, #tpu.memory_space<vmem>>) attributes {dimension_semantics = [#tpu.dimension_semantics<parallel>], iteration_bounds = array<i64: 2>, scalar_prefetch = 0 : i64, scratch_operands = 0 : i64, tpu.core_type = #tpu.core_type<tc>, window_params = [{transform_indices = @transform_0, window_bounds = array<i64: 1, 8, 128>}, {transform_indices = @transform_1, window_bounds = array<i64: 1, 8, 128>}, {transform_indices = @transform_2, window_bounds = array<i64: 1, 8, 128>}]} {
    %cst = arith.constant 0.000000e+00 : f32
    %0 = vector.broadcast %cst : f32 to vector<8x128xf32>
    %c0_i32 = arith.constant 0 : i32
    %c1_i32 = arith.constant 1 : i32
    %1 = arith.muli %c0_i32, %c1_i32 : i32
    %2 = tpu.assume_multiple %1, 1 : i32
    %3 = arith.index_cast %2 : i32 to index
    %c0 = arith.constant 0 : index
    %c0_0 = arith.constant 0 : index
    %4 = vector.load %arg1[%3, %c0, %c0_0] : memref<1x8x128xf32, #tpu.memory_space<vmem>>, vector<1x8x128xf32>
    %5 = arith.index_cast %2 : i32 to index
    %c0_1 = arith.constant 0 : index
    %c0_2 = arith.constant 0 : index
    %6 = vector.load %arg2[%5, %c0_1, %c0_2] : memref<1x8x128xf32, #tpu.memory_space<vmem>>, vector<1x8x128xf32>
    %7 = arith.subf %4, %6 : vector<1x8x128xf32>
    %8 = arith.mulf %7, %7 : vector<1x8x128xf32>
    %cst_3 = arith.constant dense<0.000000e+00> : vector<8x128xf32>
    %9 = vector.multi_reduction <add>, %8, %cst_3 [0] : vector<1x8x128xf32> to vector<8x128xf32>
    %10 = arith.addf %0, %9 : vector<8x128xf32>
    %c1_i32_4 = arith.constant 1 : i32
    %c0_5 = arith.constant 0 : index
    %c0_6 = arith.constant 0 : index
    %c0_7 = arith.constant 0 : index
    %11 = vector.load %arg3[%c0_5, %c0_6, %c0_7] : memref<1x8x128xf32, #tpu.memory_space<vmem>>, vector<1x8x128xf32>
    %12 = vector.shape_cast %11 : vector<1x8x128xf32> to vector<8x128xf32>
    %13 = vector.shape_cast %10 : vector<8x128xf32> to vector<1x8x128xf32>
    tpu.vector_store %arg3[%c0_5, %c0_6, %c0_7], %13 {strides = array<i32>} : memref<1x8x128xf32, #tpu.memory_space<vmem>>, vector<1x8x128xf32>,
    return
  }
  func.func @transform_0(%arg0: i32) -> (i32, i32, i32) {
    %c0_i32 = arith.constant 0 : i32
    %c0_i32_0 = arith.constant 0 : i32
    %c0_i32_1 = arith.constant 0 : i32
    return %arg0, %c0_i32, %c0_i32_0 : i32, i32, i32
  }
  func.func @transform_1(%arg0: i32) -> (i32, i32, i32) {
    %c0_i32 = arith.constant 0 : i32
    %c0_i32_0 = arith.constant 0 : i32
    %c0_i32_1 = arith.constant 0 : i32
    return %arg0, %c0_i32, %c0_i32_0 : i32, i32, i32
  }
  func.func @transform_2(%arg0: i32) -> (i32, i32, i32) {
    %c0_i32 = arith.constant 0 : i32
    %c0_i32_0 = arith.constant 0 : i32
    %c0_i32_1 = arith.constant 0 : i32
    return %arg0, %c0_i32, %c0_i32_0 : i32, i32, i32
  }
}

</mosaic_0001>

<bundles_post_ra>
// kernel: tpu_custom_call.1
= control target key start
LH: loop header
LB: loop body
LE: loop exit
PB: predicated region body
PF: predicated region fallthrough
CT: control target
= control target key end

     0   :  { %7 = vsyncpa [#allocation3], 0  ;;  %s717_s0 = inlined_call_operand.hbm [shape: f32[2,8,128], index: 0, kind: input, shape index: {}]   ;;  %s718_s1 = inlined_call_operand.hbm [shape: f32[2,8,128], index: 1, kind: input, shape index: {}]   ;;  %s719_s2 = inlined_call_operand.hbm [shape: f32[2,8,128], index: 2, kind: output, shape index: {}]  }
   0x1   :  { %9 = vsyncpa [#allocation3 + $0x1], 0 }
   0x2   :  { %10 = vsyncpa [#allocation6], 0 }
   0x3   :  { %12 = vsyncpa [#allocation6 + $0x1], 0 }
   0x4   :  { %13 = vsyncpa [#allocation4], 0 }
   0x5   :  { %15 = vsyncpa [#allocation4 + $0x1], 0  ;;  %s523_s9 = smov 0   ;;  %s525_s10 = smov 0  }
   0x6   :  { %s527_s11 = smov 0   ;;  %s529_s12 = smov 0  }
   0x7 LB: > { %s544_s13 = sadd.s32 4294967295, %s503_s12   ;;  %s313_s14 = sadd.s32 4294967294, %s503_s12   ;;  %s503_s12 = sphi %s529_s12, %s738_s12   ;;  %s499_s11 = sphi %s527_s11, %s737_s11   ;;  %s495_s10 = sphi %s525_s10, %s736_s10   ;;  %s491_s9 = sphi %s523_s9, %s735_s9  }
   0x8   : > { %s548_s15 = sadd.s32 1, %s503_s12   ;;  %s28_s16 = sadd.s32 1, %s499_s11 }
   0x9   : > { %s25_s17 = ssub.s32 %s503_s12, %s548_s15  ;;  %p35_p0 = scmp.ne.s32.totalorder %s499_s11, %s495_s10 }
   0xa   : > { %p26_p1 = scmp.eq.s32.totalorder %s25_s17, 0  ;;  %p36_p2 = scmp.eq.s32.totalorder %s503_s12, 0 }
   0xb   : > { %p41_p3 = scmp.ne.s32.totalorder %s495_s10, %s491_s9  ;;  %p42_p4 = scmp.eq.s32.totalorder %s544_s13, 0 }
   0xc   : > { %s560_s18 = scalar_select %p26_p1, %s499_s11, %s28_s16  }
   0xd   : > { %p562_p5 = por %p36_p2, %p35_p0  ;;  %p566_p6 = por %p42_p4, %p41_p3 }
   0xe   : > { %p91_p7 = scmp.eq.s32.totalorder %s544_s13, 1  ;;  %p97_p8 = scmp.eq.s32.totalorder %s313_s14, 1 }
   0xf   : > { %s723_s20 = scalar_select %p566_p6, 1, 0 }
  0x10   : > { %p345_p10 = scmp.lt.s32.totalorder %s503_s12, 2  ;;  %p573_p11 = por %p91_p7, %p35_p0 }
  0x11   : > { %p577_p12 = por %p97_p8, %p41_p3  ;;  %s582_s23 = sand.u32 1, %s499_s11  }
  0x12   : > { %s724_s21 = scalar_select %p573_p11, 1, 0 }
  0x13   : > { %s725_s22 = scalar_select %p577_p12, 1, 0 }
  0x14   : > { %s317_s24 = sshll.u32 %s503_s12, 7  ;;  %s316_s25 = sshll.u32 %s582_s23, 3 }
  0x15   : > { %s591_s28 = scalar_lea.hbm %s717_s0, %s317_s24  ;;  %s121_s29 = scalar_lea.vmem [#allocation2], %s316_s25 }
  0x16   : > { %s128_s30 = sshll.u32 %s121_s29, 4  ;;  %p597_p13 = pnand %p345_p10, %p562_p5  ;;  %s601_s30 = int_to_ptr.vmem [resolvable:$true] %s128_s30 }
  0x17   : > { %s118_s4 = scalar_lea.sflag [#allocation3], %s582_s23  ;;  %s379_s5 = scalar_lea.hbm %s591_s28, 128 }
  0x18   : > { %p380_p2 = scmp.ne.s32.totalorder %s591_s28, %s379_s5  ;;  %p381_p3 = pneg %p597_p13 }
  0x19   : > { %s384_s8 = scalar_lea.hbm %s717_s0, 256  ;;  %p385_p5 = scmp.lt.s32.totalorder %s591_s28, %s717_s0 }
  0x1a   : > { %p382_p4 = pnand %p381_p3, %p380_p2  ;;  %p386_p8 = scmp.lt.s32.totalorder %s384_s8, %s379_s5 }
  0x1c   : > { %p383_p7 = pneg %p382_p4  ;;  %p387_p10 = por %p386_p8, %p385_p5 }
  0x1e   : > { %p388_p9 = pnand %p387_p10, %p383_p7 }
  0x20   : > { %391 = shalt.err (!%p388_p9)
}
  0x21   : > { %s392_s17 = scalar_lea.vmem %s601_s30, 128  ;;  %s505_s19 = smov [#allocation2]  }
  0x22   : > { %p393_p0 = scmp.ne.s32.totalorder %s601_s30, %s392_s17  ;;  %s397_s26 = sshll.u32 %s505_s19, 4  ;;  %s398_s26 = int_to_ptr.vmem [resolvable:$false] %s397_s26 }
  0x23   : > { %s399_s27 = scalar_lea.vmem %s398_s26, 256  ;;  %p400_p1 = scmp.lt.s32.totalorder %s601_s30, %s398_s26 }
  0x24   : > { %p395_p2 = pnand %p393_p0, %p381_p3  ;;  %p401_p12 = scmp.lt.s32.totalorder %s399_s27, %s392_s17 }
  0x26   : > { %p396_p4 = pneg %p395_p2  ;;  %p402_p11 = por %p401_p12, %p400_p1 }
  0x28   : > { %p403_p5 = pnand %p402_p11, %p396_p4 }
  0x2a   : > { %406 = shalt.err (!%p403_p5)
}
  0x2b   : > { %337 = dma.hbm_to_vmem [thread:$0]  (!%p597_p13), %s591_s28, 128, %s601_s30, %s118_s4  }
  0x2c   : > { %p727_p9 = scmp.lt.s32.totalorder %s503_s12, 3  ;;  %p728_p0 = scmp.ge.s32.totalorder %s503_s12, 1 }
  0x2d   : > { %s643_s7 = scalar_lea.hbm %s718_s1, %s317_s24  ;;  %s139_s8 = scalar_lea.vmem [#allocation5], %s316_s25 }
  0x2e   : > { %p634_p7 = pnand %p728_p0, %p727_p9  ;;  %s146_s14 = sshll.u32 %s139_s8, 4  ;;  %s147_s14 = int_to_ptr.vmem [resolvable:$true] %s146_s14 }
  0x2f   : > { %s136_s28 = scalar_lea.sflag [#allocation6], %s582_s23  ;;  %s407_s30 = scalar_lea.hbm %s643_s7, 128 }
  0x30   : > { %s729_s29 = scalar_select %p634_p7, 1, 0 }
  0x31   : > { %p408_p11 = scmp.ne.s32.totalorder %s643_s7, %s407_s30  ;;  %s412_s17 = scalar_lea.hbm %s718_s1, 256 }
  0x32   : > { %p413_p8 = scmp.lt.s32.totalorder %s643_s7, %s718_s1  ;;  %p414_p10 = scmp.lt.s32.totalorder %s412_s17, %s407_s30 }
  0x33   : > { %p410_p12 = pnand %p408_p11, %p381_p3 }
  0x34   : > { %p415_p2 = por %p414_p10, %p413_p8 }
  0x35   : > { %p411_p1 = pneg %p410_p12 }
  0x37   : > { %p416_p4 = pnand %p415_p2, %p411_p1 }
  0x39   : > { %419 = shalt.err (!%p416_p4)
}
  0x3a   : > { %s420_s25 = scalar_lea.vmem %s147_s14, 128  ;;  %s506_s23 = smov [#allocation5]  }
  0x3b   : > { %p421_p5 = scmp.ne.s32.totalorder %s147_s14, %s420_s25  ;;  %s425_s26 = sshll.u32 %s506_s23, 4  ;;  %s426_s26 = int_to_ptr.vmem [resolvable:$false] %s425_s26 }
  0x3c   : > { %s427_s27 = scalar_lea.vmem %s426_s26, 256  ;;  %p428_p11 = scmp.lt.s32.totalorder %s147_s14, %s426_s26 }
  0x3d   : > { %p423_p9 = pnand %p421_p5, %p381_p3  ;;  %p429_p12 = scmp.lt.s32.totalorder %s427_s27, %s420_s25 }
  0x3f   : > { %p424_p0 = pneg %p423_p9  ;;  %p430_p6 = por %p429_p12, %p428_p11 }
  0x41   : > { %p431_p7 = pnand %p430_p6, %p424_p0 }
  0x43   : > { %434 = shalt.err (!%p431_p7)
}
  0x44   : > { %340 = dma.hbm_to_vmem [thread:$0]  (!%p597_p13), %s643_s7, 128, %s147_s14, %s136_s28  }
  0x45   : > { %p730_p1 = scmp.ne.s32.totalorder %s729_s29, 0 }
  0x46   : > { %s669_s5 = sand.u32 (!%p730_p1), 1, %s495_s10   ;;  %p731_p3 = scmp.ne.s32.totalorder (!%p730_p1), %s723_s20, 0 }
  0x47   : > { %155 = sbr.rel (%p730_p1) target bundleno = 104 (0x68), region = 28  ;;  %s321_s6 = sshll.u32 (!%p730_p1), %s669_s5, 3 }
  0x48   : > { %s158_s8 = scalar_lea.sflag (!%p730_p1), [#allocation3], %s669_s5  ;;  %s161_s30 = scalar_lea.vmem (!%p730_p1), [#allocation2], %s321_s6 }
  0x4c   : > { %478 = dma.done.wait (%p731_p3), %s158_s8, 128  }
  0x4d   : > { %480 = vsyncadd (%p731_p3), %s158_s8, 4294967168  ;;  %s167_s3 = scalar_lea.sflag [#allocation6], %s669_s5  ;;  %s170_s7 = scalar_lea.vmem [#allocation5], %s321_s6 }
  0x4e   : > { %482 = dma.done.wait (%p731_p3), %s167_s3, 128  }
  0x4f   : > { %484 = vsyncadd (%p731_p3), %s167_s3, 4294967168  ;;  %v198_v0 = vld [vmem:[%s161_s30] sm:$0xff]  ;;  %v200_v1 = vld [vmem:[%s170_s7] sm:$0xff]  ;;  %s195_s29 = scalar_lea.vmem [#allocation7], %s321_s6  ;;  %s325_s28 = sshll.u32 %s544_s13, 7 }
  0x50   : > { %s220_s14 = sshll.u32 %s195_s29, 4  ;;  %v201_v2 = vsub.f32 %v198_v0, %v200_v1  ;;  %s218_s17 = scalar_lea.hbm %s719_s2, %s325_s28  ;;  %s221_s14 = int_to_ptr.vmem [resolvable:$true] %s220_s14 }
  0x51   : > { %s207_s24 = scalar_lea.sflag [#allocation4], %s669_s5  ;;  %s435_s19 = scalar_lea.vmem %s221_s14, 128 }
  0x52   : > { %v202_v3 = vmul.f32 %v201_v2, %v201_v2  ;;  %p436_p6 = scmp.ne.s32.totalorder %s221_s14, %s435_s19  ;;  %p732_p13 = scmp.ne.s32.totalorder %s724_s21, 0 }
  0x53   : > { %s507_s20 = smov [#allocation7]  }
  0x54   : > { %205 = vst [vmem:[%s195_s29] sm:$0xff] %v202_v3  ;;  %p437_p7 = pnand %p436_p6, %p732_p13  ;;  %s439_s25 = sshll.u32 %s507_s20, 4  ;;  %s440_s25 = int_to_ptr.vmem [resolvable:$false] %s439_s25 }
  0x55   : > { %s441_s23 = scalar_lea.vmem %s440_s25, 256  ;;  %p442_p10 = scmp.lt.s32.totalorder %s221_s14, %s440_s25 }
  0x56   : > { %p438_p8 = pneg %p437_p7  ;;  %p443_p2 = scmp.lt.s32.totalorder %s441_s23, %s435_s19 }
  0x58   : > { %p444_p4 = por %p443_p2, %p442_p10 }
  0x5a   : > { %p445_p5 = pnand %p444_p4, %p438_p8 }
  0x5c   : > { %448 = shalt.err (!%p445_p5)
}
  0x5d   : > { %s449_s13 = scalar_lea.hbm %s218_s17, 128  ;;  %s453_s5 = scalar_lea.hbm %s719_s2, 256 }
  0x5e   : > { %p450_p9 = scmp.ne.s32.totalorder %s218_s17, %s449_s13  ;;  %p454_p12 = scmp.lt.s32.totalorder %s218_s17, %s719_s2 }
  0x5f   : > { %p455_p1 = scmp.lt.s32.totalorder %s453_s5, %s449_s13 }
  0x60   : > { %p451_p0 = pnand %p450_p9, %p732_p13 }
  0x61   : > { %p456_p3 = por %p455_p1, %p454_p12 }
  0x62   : > { %p452_p11 = pneg %p451_p0 }
  0x64   : > { %p457_p6 = pnand %p456_p3, %p452_p11 }
  0x66   : > { %460 = shalt.err (!%p457_p6)
}
  0x67   : > { %332 = dma.vmem_to_hbm [thread:$0]  (%p732_p13), %s221_s14, 128, %s218_s17, %s207_s24  }
  0x68 PF: > { %s232_s30 = sand.u32 1, %s491_s9   ;;  %p733_p7 = scmp.ne.s32.totalorder %s725_s22, 0 }
  0x69   : > { %p734_p8 = scmp.ge.s32.totalorder %s503_s12, 2  ;;  %s233_s3 = scalar_lea.sflag [#allocation4], %s232_s30 }
  0x6b   : > { %p342_p10 = pnand %p734_p8, %p733_p7 }
  0x6d   : > { %p343_p2 = pneg %p342_p10 }
  0x6f   : > { %486 = dma.done.wait (%p343_p2), %s233_s3, 128  }
  0x70   : > { %488 = vsyncadd (%p343_p2), %s233_s3, 4294967168  ;;  %p18_p4 = scmp.ge.s32.totalorder %s548_s15, 4   ;;  %s735_s9 = smov %s495_s10 }
  0x71   : > { %s736_s10 = smov %s499_s11  ;;  %s737_s11 = smov %s560_s18 }
  0x72   : > { %s738_s12 = smov %s548_s15  ;;  %20 = sbr.rel (!%p18_p4) target bundleno = 7 (0x7), region = 88 }
  0x77   :  { %238 = vsyncpa [#allocation3], 1 }
  0x78   :  { %240 = vsyncpa [#allocation3 + $0x1], 1 }
  0x79   :  { %241 = vsyncpa [#allocation6], 1 }
  0x7a   :  { %243 = vsyncpa [#allocation6 + $0x1], 1 }
  0x7b   :  { %244 = vsyncpa [#allocation4], 1 }
  0x7c   :  { %246 = vsyncpa [#allocation4 + $0x1], 1 }

</bundles_post_ra>
